<compile_context>
chip_gen: v7x
topology: tpu7x:2x2x1
jax: 0.10.0
libtpu: 0.0.40
codegen_flags: <defaults>
</compile_context>

<pallas_src>
import functools

import jax
import jax.numpy as jnp
from jax.experimental import pallas as pl
from jax.experimental.pallas import tpu as pltpu


def _round_up(a, b):
    return (a + b - 1) // b * b


def _pool_kernel(x_ref, *refs, sh, sw, Wc, Wo, K, G, mode, inv_area):
    """Pool one tile of packed rows.

    x_ref : (TR, G*K)   -- each lane-row packs G independent output rows;
                           group g occupies lanes [g*K, (g+1)*K) and holds the
                           sh cropped input rows (each Wc wide) feeding that
                           output row.
    o_ref : (TR, G*Wo)
    mat_ref (optional, resident): column-pooling matrix.
        max: one-hot decimation (Wp, Wo);  avg: banded average (Wc, Wo)*inv_area.
    """
    mat_ref = refs[0] if len(refs) == 2 else None
    o_ref = refs[-1]
    mat = mat_ref[...] if mat_ref is not None else None

    for g in range(G):
        base = g * K
        if Wo == 1:
            # Whole group row is a single window: plain lane reduce.
            xg = x_ref[:, base:base + K]
            if mode == "max":
                res = jnp.max(xg, axis=-1, keepdims=True)
            else:
                res = jnp.sum(xg.astype(jnp.float32), axis=-1,
                              keepdims=True) * inv_area
        else:
            # Stage 1: combine the sh window rows (contiguous lane chunks, VPU).
            # Max stays in the native dtype; avg accumulates in f32.
            def _load(r, _base=base):
                c = x_ref[:, _base + r * Wc:_base + (r + 1) * Wc]
                return c if mode == "max" else c.astype(jnp.float32)

            y = _load(0)
            for r in range(1, sh):
                y = jnp.maximum(y, _load(r)) if mode == "max" else y + _load(r)

            if mode == "avg":
                if sw == 1:
                    res = y * inv_area
                else:
                    # Stages 2+3+scale fused into one banded matmul (MXU),
                    # matrix is resident in VMEM (hoisted to the wrapper).
                    res = jnp.dot(y, mat, preferred_element_type=jnp.float32)
            else:
                if sw == 1:
                    res = y
                else:
                    # Stage 2: sliding max over the sw window columns (VPU).
                    Wp = Wc - sw + 1
                    z = y[:, 0:Wp]
                    for c in range(1, sw):
                        z = jnp.maximum(z, y[:, c:c + Wp])
                    # Stage 3: decimate with the resident one-hot matrix (MXU);
                    # exact for max (single 1.0 term per output column).
                    res = jnp.dot(z, mat, preferred_element_type=jnp.float32)

        o_ref[:, g * Wo:(g + 1) * Wo] = res.astype(o_ref.dtype)


def pool_block(x, pool="max", size=None, stride=None):
    """Pallas equivalent of PoolBlock.forward.

    Matches the PyTorch module: the pooling op always uses
    kernel_size == stride == `size` (the module's `stride` argument only
    affects its `dim` bookkeeping, not the op); size=None is global pooling.
    """
    assert pool in ("max", "avg")
    assert jnp.issubdtype(x.dtype, jnp.floating), "pooling kernel expects floats"
    del stride  # only used for the module's dim bookkeeping, not the forward op

    N, C, H, W = x.shape
    if size is None:
        sh, sw = H, W
    else:
        sh = sw = int(size)
    Ho, Wo = H // sh, W // sw
    assert Ho >= 1 and Wo >= 1, "pool window larger than input"

    Hc, Wc = Ho * sh, Wo * sw
    if (Hc, Wc) != (H, W):
        x = x[:, :, :Hc, :Wc]   # floor-mode crop (rare ragged case, extra copy)

    inv_area = 1.0 / float(sh * sw)
    R = N * C * Ho              # one logical row per output row
    K = sh * Wc                 # its sh cropped input rows flattened along lanes

    # Lane-dense packing for small feature maps: put G consecutive output rows
    # in one lane-row so input blocks are >=128 lanes wide (no 4x padded vregs).
    G = max(1, 128 // K) if K < 128 else 1
    while G > 1 and R % G != 0:
        G -= 1
    Rg, Kg = R // G, G * K
    x2 = x.reshape(Rg, Kg)      # contiguous reshape -- single HBM pass

    # Column-pooling matrix, hoisted out of the kernel (DMA'd once, resident).
    need_mat = (Wo > 1) and (sw > 1)
    mat = None
    if need_mat:
        if pool == "avg":
            w = jnp.arange(Wc)[:, None] // sw
            ow = jnp.arange(Wo)[None, :]
            mat = jnp.where(w == ow, inv_area, 0.0).astype(jnp.float32)
        else:
            Wp = Wc - sw + 1
            wp = jnp.arange(Wp)[:, None]
            ow = jnp.arange(Wo)[None, :]
            mat = (wp == ow * sw).astype(x.dtype)
    # TODO(synk): for very large Wc, replace the dense (Wc|Wp, Wo) matrix with
    # block-diagonal 128-wide column-group matmuls to bound MXU FLOPs / VMEM.

    # --- Tile sizing (double-buffered in+out tiles + resident matrix) --------
    itemsize = jnp.dtype(x.dtype).itemsize
    row_align = max(8, 32 // itemsize)             # 8 f32, 16 bf16, 32 int8
    lane_pad_in = _round_up(Kg, 128)
    lane_pad_out = _round_up(G * Wo, 128)
    mat_bytes = 0 if mat is None else int(mat.size) * jnp.dtype(mat.dtype).itemsize
    bytes_per_row = (lane_pad_in + lane_pad_out) * itemsize

    tile_budget = 36 * 1024 * 1024   # ~16-18 MiB per input buffer; fits v7x VMEM
    avail = max(tile_budget - 2 * mat_bytes, 2 * row_align * bytes_per_row)
    tr = (avail // (2 * bytes_per_row)) // row_align * row_align
    tr = max(tr, row_align)
    # TODO(synk): huge global pools (K*itemsize ~ MiB) need a lane-tiled
    # reduction grid; a single row-aligned block already exceeds the budget.

    if Rg <= row_align:
        tr = Rg                                     # single full-extent block
    else:
        # Megacore: keep >=2 (ideally 4) steps on the parallel axis so both
        # v7x TensorCores get work.
        steps = 4 if Rg >= 4 * row_align else 2
        tr = min(tr, _round_up(pl.cdiv(Rg, steps), row_align))
        tr = max(tr, row_align)
    grid = (pl.cdiv(Rg, tr),)
    # Ragged final block (Rg % tr != 0): rows are independent and Pallas drops
    # out-of-bounds writes, so padded-row garbage never reaches the output.

    kernel = functools.partial(
        _pool_kernel, sh=sh, sw=sw, Wc=Wc, Wo=Wo, K=K, G=G, mode=pool,
        inv_area=inv_area)

    in_specs = [pl.BlockSpec((tr, Kg), lambda i: (i, 0))]
    args = [x2]
    if need_mat:
        in_specs.append(pl.BlockSpec(mat.shape, lambda i: (0, 0)))
        args.append(mat)

    out = pl.pallas_call(
        kernel,
        out_shape=jax.ShapeDtypeStruct((Rg, G * Wo), x.dtype),
        grid=grid,
        in_specs=in_specs,
        out_specs=pl.BlockSpec((tr, G * Wo), lambda i: (i, 0)),
        compiler_params=pltpu.CompilerParams(
            dimension_semantics=("parallel",),
            vmem_limit_bytes=48 * 1024 * 1024,
        ),
    )(*args)
    return out.reshape(N, C, Ho, Wo)


def _ref_pool(x, pool="max", size=None):
    """Pure-JAX reference (mirrors nn.MaxPool2d/AvgPool2d(size, size))."""
    N, C, H, W = x.shape
    if size is None:
        sh, sw = H, W
    else:
        sh = sw = int(size)
    Ho, Wo = H // sh, W // sw
    xr = x[:, :, :Ho * sh, :Wo * sw].reshape(N, C, Ho, sh, Wo, sw)
    if pool == "max":
        return jnp.max(xr, axis=(3, 5))
    return jnp.mean(xr, axis=(3, 5))


if __name__ == "__main__":
    key = jax.random.PRNGKey(0)
    x = jax.random.normal(key, (2, 4, 16, 16), dtype=jnp.float32)
    xb = x.astype(jnp.bfloat16)

    cases = [
        (x,  "max", 2),      # MaxPool2d(2, 2) -> (2, 4, 8, 8)
        (x,  "avg", 2),      # AvgPool2d(2, 2) -> (2, 4, 8, 8)
        (x,  "max", 4),
        (x,  "avg", 4),
        (x,  "max", 3),      # non-divisible -> floor-mode crop path
        (x,  "avg", 3),
        (x,  "max", None),   # global max pool -> (2, 4, 1, 1)
        (x,  "avg", None),   # global avg pool -> (2, 4, 1, 1)
        (xb, "max", 2),      # bf16 stays bf16 on the max path
    ]

    ok = True
    for inp, pool, size in cases:
        got = jax.block_until_ready(pool_block(inp, pool=pool, size=size))
        want = _ref_pool(inp, pool=pool, size=size)
        tol = 1e-5 if inp.dtype == jnp.float32 else 1e-2
        same = (
            got.shape == want.shape
            and got.dtype == want.dtype
            and bool(jnp.allclose(got.astype(jnp.float32),
                                  want.astype(jnp.float32),
                                  atol=tol, rtol=tol))
        )
        if not same:
            ok = False
            print(f"MISMATCH pool={pool} size={size} dtype={inp.dtype}")

    if ok:
        print("KERNEL_OK")
</pallas_src>

<mosaic_0001>
module attributes {stable_mosaic.version = 11 : i64} {
  func.func @_pool_kernel(%arg0: i32, %arg1: memref<8x128xf32, #tpu.memory_space<vmem>>, %arg2: memref<15x8xf32, #tpu.memory_space<vmem>>, %arg3: memref<8x32xf32, #tpu.memory_space<vmem>>) attributes {dimension_semantics = [#tpu.dimension_semantics<parallel>], iteration_bounds = array<i64: 2>, scalar_prefetch = 0 : i64, scratch_operands = 0 : i64, tpu.core_type = #tpu.core_type<tc>, window_params = [{transform_indices = @transform_0, window_bounds = array<i64: 8, 128>}, {pipeline_mode = #tpu.pipeline_mode<synchronous>, transform_indices = @transform_1, window_bounds = array<i64: 15, 8>}, {transform_indices = @transform_2, window_bounds = array<i64: 8, 32>}]} {
    %c0 = arith.constant 0 : index
    %c0_0 = arith.constant 0 : index
    %0 = vector.load %arg2[%c0, %c0_0] : memref<15x8xf32, #tpu.memory_space<vmem>>, vector<15x8xf32>
    %c0_1 = arith.constant 0 : index
    %c0_2 = arith.constant 0 : index
    %1 = vector.load %arg1[%c0_1, %c0_2] : memref<8x128xf32, #tpu.memory_space<vmem>>, vector<8x16xf32>
    %c0_3 = arith.constant 0 : index
    %c16 = arith.constant 16 : index
    %2 = vector.load %arg1[%c0_3, %c16] : memref<8x128xf32, #tpu.memory_space<vmem>>, vector<8x16xf32>
    %3 = arith.maximumf %1, %2 : vector<8x16xf32>
    %4 = vector.extract_strided_slice %3 {offsets = [0, 0], sizes = [8, 15], strides = [1, 1]} : vector<8x16xf32> to vector<8x15xf32>
    %5 = vector.extract_strided_slice %3 {offsets = [0, 1], sizes = [8, 15], strides = [1, 1]} : vector<8x16xf32> to vector<8x15xf32>
    %6 = arith.maximumf %4, %5 : vector<8x15xf32>
    %cst = arith.constant dense<0.000000e+00> : vector<8x8xf32>
    %7 = tpu.matmul %6, %0, %cst {dimension_numbers = #tpu.dot_dimension_numbers<[1], [0], [0], [1], [0, 0, 1, 1], [], []>} : vector<8x15xf32>, vector<15x8xf32>, vector<8x8xf32> -> vector<8x8xf32>
    %c0_4 = arith.constant 0 : index
    %c0_5 = arith.constant 0 : index
    %8 = vector.load %arg3[%c0_4, %c0_5] : memref<8x32xf32, #tpu.memory_space<vmem>>, vector<8x8xf32>
    tpu.vector_store %arg3[%c0_4, %c0_5], %7 {strides = array<i32>} : memref<8x32xf32, #tpu.memory_space<vmem>>, vector<8x8xf32>,
    %c0_6 = arith.constant 0 : index
    %c32 = arith.constant 32 : index
    %9 = vector.load %arg1[%c0_6, %c32] : memref<8x128xf32, #tpu.memory_space<vmem>>, vector<8x16xf32>
    %c0_7 = arith.constant 0 : index
    %c48 = arith.constant 48 : index
    %10 = vector.load %arg1[%c0_7, %c48] : memref<8x128xf32, #tpu.memory_space<vmem>>, vector<8x16xf32>
    %11 = arith.maximumf %9, %10 : vector<8x16xf32>
    %12 = vector.extract_strided_slice %11 {offsets = [0, 0], sizes = [8, 15], strides = [1, 1]} : vector<8x16xf32> to vector<8x15xf32>
    %13 = vector.extract_strided_slice %11 {offsets = [0, 1], sizes = [8, 15], strides = [1, 1]} : vector<8x16xf32> to vector<8x15xf32>
    %14 = arith.maximumf %12, %13 : vector<8x15xf32>
    %cst_8 = arith.constant dense<0.000000e+00> : vector<8x8xf32>
    %15 = tpu.matmul %14, %0, %cst_8 {dimension_numbers = #tpu.dot_dimension_numbers<[1], [0], [0], [1], [0, 0, 1, 1], [], []>} : vector<8x15xf32>, vector<15x8xf32>, vector<8x8xf32> -> vector<8x8xf32>
    %c0_9 = arith.constant 0 : index
    %c8 = arith.constant 8 : index
    %16 = vector.load %arg3[%c0_9, %c8] : memref<8x32xf32, #tpu.memory_space<vmem>>, vector<8x8xf32>
    tpu.vector_store %arg3[%c0_9, %c8], %15 {strides = array<i32>} : memref<8x32xf32, #tpu.memory_space<vmem>>, vector<8x8xf32>,
    %c0_10 = arith.constant 0 : index
    %c64 = arith.constant 64 : index
    %17 = vector.load %arg1[%c0_10, %c64] : memref<8x128xf32, #tpu.memory_space<vmem>>, vector<8x16xf32>
    %c0_11 = arith.constant 0 : index
    %c80 = arith.constant 80 : index
    %18 = vector.load %arg1[%c0_11, %c80] : memref<8x128xf32, #tpu.memory_space<vmem>>, vector<8x16xf32>
    %19 = arith.maximumf %17, %18 : vector<8x16xf32>
    %20 = vector.extract_strided_slice %19 {offsets = [0, 0], sizes = [8, 15], strides = [1, 1]} : vector<8x16xf32> to vector<8x15xf32>
    %21 = vector.extract_strided_slice %19 {offsets = [0, 1], sizes = [8, 15], strides = [1, 1]} : vector<8x16xf32> to vector<8x15xf32>
    %22 = arith.maximumf %20, %21 : vector<8x15xf32>
    %cst_12 = arith.constant dense<0.000000e+00> : vector<8x8xf32>
    %23 = tpu.matmul %22, %0, %cst_12 {dimension_numbers = #tpu.dot_dimension_numbers<[1], [0], [0], [1], [0, 0, 1, 1], [], []>} : vector<8x15xf32>, vector<15x8xf32>, vector<8x8xf32> -> vector<8x8xf32>
    %c0_13 = arith.constant 0 : index
    %c16_14 = arith.constant 16 : index
    %24 = vector.load %arg3[%c0_13, %c16_14] : memref<8x32xf32, #tpu.memory_space<vmem>>, vector<8x8xf32>
    tpu.vector_store %arg3[%c0_13, %c16_14], %23 {strides = array<i32>} : memref<8x32xf32, #tpu.memory_space<vmem>>, vector<8x8xf32>,
    %c0_15 = arith.constant 0 : index
    %c96 = arith.constant 96 : index
    %25 = vector.load %arg1[%c0_15, %c96] : memref<8x128xf32, #tpu.memory_space<vmem>>, vector<8x16xf32>
    %c0_16 = arith.constant 0 : index
    %c112 = arith.constant 112 : index
    %26 = vector.load %arg1[%c0_16, %c112] : memref<8x128xf32, #tpu.memory_space<vmem>>, vector<8x16xf32>
    %27 = arith.maximumf %25, %26 : vector<8x16xf32>
    %28 = vector.extract_strided_slice %27 {offsets = [0, 0], sizes = [8, 15], strides = [1, 1]} : vector<8x16xf32> to vector<8x15xf32>
    %29 = vector.extract_strided_slice %27 {offsets = [0, 1], sizes = [8, 15], strides = [1, 1]} : vector<8x16xf32> to vector<8x15xf32>
    %30 = arith.maximumf %28, %29 : vector<8x15xf32>
    %cst_17 = arith.constant dense<0.000000e+00> : vector<8x8xf32>
    %31 = tpu.matmul %30, %0, %cst_17 {dimension_numbers = #tpu.dot_dimension_numbers<[1], [0], [0], [1], [0, 0, 1, 1], [], []>} : vector<8x15xf32>, vector<15x8xf32>, vector<8x8xf32> -> vector<8x8xf32>
    %c0_18 = arith.constant 0 : index
    %c24 = arith.constant 24 : index
    %32 = vector.load %arg3[%c0_18, %c24] : memref<8x32xf32, #tpu.memory_space<vmem>>, vector<8x8xf32>
    tpu.vector_store %arg3[%c0_18, %c24], %31 {strides = array<i32>} : memref<8x32xf32, #tpu.memory_space<vmem>>, vector<8x8xf32>,
    return
  }
  func.func @transform_0(%arg0: i32) -> (i32, i32) {
    %c0_i32 = arith.constant 0 : i32
    %c0_i32_0 = arith.constant 0 : i32
    return %arg0, %c0_i32 : i32, i32
  }
  func.func @transform_1(%arg0: i32) -> (i32, i32) {
    %c0_i32 = arith.constant 0 : i32
    %c0_i32_0 = arith.constant 0 : i32
    %c0_i32_1 = arith.constant 0 : i32
    return %c0_i32, %c0_i32_0 : i32, i32
  }
  func.func @transform_2(%arg0: i32) -> (i32, i32) {
    %c0_i32 = arith.constant 0 : i32
    %c0_i32_0 = arith.constant 0 : i32
    return %arg0, %c0_i32 : i32, i32
  }
}

</mosaic_0001>

<bundles_post_ra>
// kernel: tpu_custom_call.1
= control target key start
LH: loop header
LB: loop body
LE: loop exit
PB: predicated region body
PF: predicated region fallthrough
CT: control target
= control target key end

     0   :  { %7 = vsyncpa [#allocation3], 0  ;;  %s924_s0 = inlined_call_operand.vmem [shape: f32[16,128], index: 0, kind: input, shape index: {}]   ;;  %s925_s1 = inlined_call_operand.vmem [shape: f32[15,8], index: 1, kind: input, shape index: {}]   ;;  %s926_s2 = inlined_call_operand.hbm [shape: f32[16,32], index: 2, kind: output, shape index: {}]  }
   0x1   :  { %9 = vsyncpa [#allocation3 + $0x1], 0  ;;  %s798_s9 = smov 0   ;;  %s800_s10 = smov 0  }
   0x2   :  { %s802_s11 = smov 0   ;;  %s804_s12 = smov 0  }
   0x3 LB: > { %s819_s13 = sadd.s32 4294967295, %s768_s12   ;;  %s581_s14 = sadd.s32 4294967294, %s768_s12   ;;  %s768_s12 = sphi %s804_s12, %s934_s12   ;;  %s764_s11 = sphi %s802_s11, %s933_s11   ;;  %s760_s10 = sphi %s800_s10, %s932_s10   ;;  %s756_s9 = sphi %s798_s9, %s931_s9  }
   0x4   : > { %s823_s15 = sadd.s32 1, %s768_s12   ;;  %s69_s16 = sadd.s32 1, %s764_s11 }
   0x5   : > { %s66_s17 = ssub.s32 %s768_s12, %s823_s15  ;;  %p79_p0 = scmp.ne.s32.totalorder %s764_s11, %s760_s10 }
   0x6   : > { %p67_p1 = scmp.eq.s32.totalorder %s66_s17, 0  ;;  %p80_p2 = scmp.eq.s32.totalorder %s819_s13, 1 }
   0x7   : > { %p85_p3 = scmp.ne.s32.totalorder %s760_s10, %s756_s9  ;;  %p86_p4 = scmp.eq.s32.totalorder %s581_s14, 1 }
   0x8   : > { %s834_s18 = scalar_select %p67_p1, %s764_s11, %s69_s16  }
   0x9   : > { %p836_p5 = por %p80_p2, %p79_p0  ;;  %p840_p6 = por %p86_p4, %p85_p3 }
   0xa   : > { %p584_p7 = scmp.ge.s32.totalorder %s768_s12, 1  ;;  %p114_p8 = scmp.lt.s32.totalorder %s768_s12, 3 }
   0xc   : > { %p115_p9 = pnand %p584_p7, %p114_p8 }
   0xd   : > { %p135_p10 = scmp.lt.s32.totalorder (!%p115_p9), %s819_s13, 1  ;;  %s770_s26 = smov (!%p115_p9), 112   ;;  %v139_v1 = vld [vmem:[%s925_s1] sm:$0xff] (!%p115_p9)  ;;  %v140_v2 = vld [vmem:[%s925_s1 + $0x8] sm:$0x7f] (!%p115_p9)  ;;  %v771_v3 = vmov (!%p115_p9), 0.0|0.0  }
   0xe   : > { %118 = sbr.rel (%p115_p9) target bundleno = 721 (0x2d1), region = 28  ;;  %639 = vmatprep.subr.bf16.mxu0 (!%p115_p9), %v771_v3  ;;  %vm156_vm0 = vcmask (!%p115_p9), 1046528   ;;  %v640_v4 = vpack.c.bf16 (!%p115_p9), %v140_v2, %v139_v1  ;;  %643 = vmatprep.subr.bf16.mxu1 (!%p115_p9), %v771_v3  ;;  %vm772_vm1 = vmmov (!%p115_p9), 1   ;;  %vm773_vm3 = vmmov (!%p115_p9), 0   ;;  %s775_s3 = smov (!%p115_p9), 127  }
   0xf   : > { %vm857_vm2 = vmpackc.low (!%p115_p9), %vm156_vm0, %vm772_vm1  ;;  %v774_v6 = vmov (!%p115_p9), 0.0   ;;  %s776_s4 = smov (!%p115_p9), 96   ;;  %s777_s5 = smov (!%p115_p9), 32   ;;  %vm152_vm4 = vcmask (!%p115_p9), 121856   ;;  %vm230_vm5 = vcmask (!%p115_p9), 64512   ;;  %vm322_vm6 = vcmask (!%p115_p9), 130112  }
  0x10   : > { %642 = vmatpush3.bf16.msk.msra.mxu0 (!%p115_p9), %vm857_vm2, %v640_v4  ;;  %646 = vmatpush3.bf16.msk.msra.mxu1 (!%p115_p9), %vm857_vm2, %v640_v4  ;;  %s778_s6 = smov (!%p115_p9), 64   ;;  %s132_s7 = sand.u32 (!%p115_p9), 1, %s760_s10   ;;  %vm414_vm7 = vcmask (!%p115_p9), 195712   ;;  %vm506_vm8 = vcmask (!%p115_p9), 261312  }
  0x11   : > { %647 = vmatprep.subr.bf16.mxu0 (!%p115_p9), %v771_v3  ;;  %651 = vmatprep.subr.bf16.mxu1 (!%p115_p9), %v771_v3  ;;  %s585_s8 = sshll.u32 (!%p115_p9), %s132_s7, 3  ;;  %s779_s16 = smov (!%p115_p9), 8  }
  0x12   : > { %615 = vmatprep.mubr.msk.f32.mxu0 (!%p115_p9), %vm773_vm3, %v774_v6  ;;  %622 = vmatprep.mubr.msk.f32.mxu1 (!%p115_p9), %vm773_vm3, %v774_v6  ;;  %s134_s14 = scalar_lea.vmem (!%p115_p9), [#allocation2], %s585_s8  ;;  %s780_s17 = smov (!%p115_p9), 24  }
  0x13   : > { %s522_s23 = sshll.u32 (!%p115_p9), %s134_s14, 4  ;;  %s509_s27 = scalar_lea.sflag (!%p115_p9), [#allocation3], %s132_s7  ;;  %s882_s23 = int_to_ptr.vmem [resolvable:$true] %s522_s23 }
  0x14   : > { %s782_s28 = smov (!%p115_p9), [#allocation2]  }
  0x15   : > { %s136_s21 = scalar_select %p135_p10, %s819_s13, 1 }
  0x16   : > { %s710_s29 = sshll.u32 %s782_s28, 4  ;;  %s711_s29 = int_to_ptr.vmem [resolvable:$false] %s710_s29 }
  0x17   : > { %s586_s22 = sshll.u32 %s136_s21, 3  ;;  %s781_s21 = smov 16  }
  0x18   : > { %s138_s25 = scalar_lea.vmem %s924_s0, %s586_s22  ;;  %s596_s22 = sshll.u32 %s819_s13, 7 }
  0x19   : > { %v232_v0 = vld [vmem:[%s138_s25] sm:$0xff]  ;;  %s706_s13 = scalar_lea.vmem %s882_s23, 128  ;;  %s712_s30 = scalar_lea.vmem %s711_s29, 256 }
  0x1a   : > { %234 = vrot.lane.b32.xlu0 %v232_v0, %s770_s26  ;;  %418 = vrot.lane.b32.xlu1 %v232_v0, %s770_s26  ;;  %p707_p11 = scmp.ne.s32.totalorder %s882_s23, %s706_s13  ;;  %p713_p0 = scmp.lt.s32.totalorder %s882_s23, %s711_s29 }
  0x1b   : > { %p714_p1 = scmp.lt.s32.totalorder %s712_s30, %s706_s13 }
  0x1c   : > { %p708_p12 = pnand %p707_p11, %p836_p5 }
  0x1d   : > { %p715_p2 = por %p714_p1, %p713_p0 }
  0x1e   : > { %326 = vrot.lane.b32.xlu0 %v232_v0, %s770_s26  ;;  %143 = vrot.lane.b32.xlu1 %v232_v0, %s770_s26  ;;  %s880_s26 = scalar_lea.hbm %s926_s2, %s596_s22  ;;  %p709_p13 = pneg %p708_p12 }
  0x20   : > { %p716_p3 = pnand %p715_p2, %p709_p13 }
  0x8c   : > { %v235_v7 = vpop.permute.xlu0 %234  ;;  %v419_v8 = vpop.permute.xlu1 %418 }
  0x8d   : > { %v237_v9 = vmax.f32 %v232_v0, %v235_v7  ;;  %v421_v10 = vmax.f32 %v232_v0, %v419_v8 }
  0x8f   : > { %239 = vrot.lane.b32.xlu0 %v237_v9, %s775_s3 }
  0x90   : > { %v327_v11 = vpop.permute.xlu0 %326  ;;  %v144_v12 = vpop.permute.xlu1 %143 }
  0x91   : > { %v329_v13 = vmax.f32 %v232_v0, %v327_v11  ;;  %v146_v14 = vmax.f32 %v232_v0, %v144_v12 }
  0x93   : > { %423 = vrot.lane.b32.xlu0 %v421_v10, %s775_s3  ;;  %331 = vrot.lane.b32.xlu1 %v329_v13, %s775_s3 }
  0x97   : > { %148 = vrot.lane.b32.xlu1 %v146_v14, %s775_s3 }
 0x101   : > { %v240_v15 = vpop.permute.xlu0 %239 }
 0x102   : > { %v242_v16 = vmax.f32 %v237_v9, %v240_v15 }
 0x104   : > { %244 = vrot.lane.b32.xlu0 %v242_v16, %s776_s4 }
 0x105   : > { %v424_v17 = vpop.permute.xlu0 %423  ;;  %v332_v18 = vpop.permute.xlu1 %331 }
 0x106   : > { %v426_v19 = vmax.f32 %v421_v10, %v424_v17  ;;  %v334_v20 = vmax.f32 %v329_v13, %v332_v18 }
 0x108   : > { %428 = vrot.lane.b32.xlu0 %v426_v19, %s777_s5  ;;  %336 = vrot.lane.b32.xlu1 %v334_v20, %s778_s6 }
 0x109   : > { %v149_v21 = vpop.permute.xlu1 %148 }
 0x10a   : > { %v151_v22 = vmax.f32 %v146_v14, %v149_v21 }
 0x10c   : > { %616 = vmatmul.mubr.msk.f32.vlgmr.msra.gmra.mrb[0].mxu0 %vm152_vm4, %v151_v22 }
 0x10d   : > { %650 = vmatpush3.bf16.msk.msra.mxu0 %vm857_vm2, %v640_v4  ;;  %629 = vmatprep.mubr.msk.f32.mxu0 %vm773_vm3, %v774_v6 }
 0x176   : > { %v245_v23 = vpop.permute.xlu0 %244 }
 0x177   : > { %623 = vmatmul.mubr.msk.f32.vlgmr.msra.gmra.mrb[0].mxu1 %vm152_vm4, %v245_v23 }
 0x178   : > { %654 = vmatpush3.bf16.msk.msra.mxu1 %vm857_vm2, %v640_v4  ;;  %636 = vmatprep.mubr.msk.f32.mxu1 %vm773_vm3, %v774_v6 }
 0x17a   : > { %v429_v24 = vpop.permute.xlu0 %428  ;;  %v337_v25 = vpop.permute.xlu1 %336 }
 0x17b   : > { %630 = vmatmul.mubr.msk.f32.vlgmr.msra.gmra.mrb[2].mxu0 %vm152_vm4, %v337_v25  ;;  %637 = vmatmul.mubr.msk.f32.vlgmr.msra.gmra.mrb[2].mxu1 %vm152_vm4, %v429_v24 }
 0x1df   : > { %v226_v26 = vpop.f32.mrb[0].mxu0 }
 0x1e0   : > { %231 = vst.msk [vmem:[%s134_s14] sm:$0xff] %vm230_vm5, %v226_v26  ;;  %v617_v27 = vpop.f32.mrb[1].mxu0 }
 0x24a   : > { %v314_v28 = vpop.f32.mrb[0].mxu1 }
 0x24b   : > { %v624_v29 = vpop.f32.mrb[1].mxu1  ;;  %319 = vrot.lane.b32.xlu1 %v314_v28, %s779_s16 }
 0x24e   : > { %v406_v30 = vpop.f32.mrb[2].mxu0  ;;  %v498_v31 = vpop.f32.mrb[2].mxu1 }
 0x24f   : > { %v638_v32 = vpop.f32.mrb[3].mxu1  ;;  %503 = vrot.lane.b32.xlu1 %v498_v31, %s780_s17  ;;  %411 = vrot.lane.b32.xlu0 %v406_v30, %s781_s21  ;;  %v631_v33 = vpop.f32.mrb[3].mxu0 }
 0x2bd   : > { %v320_v34 = vpop.permute.xlu1 %319 }
 0x2be   : > { %323 = vst.msk [vmem:[%s134_s14] sm:$0xff] %vm322_vm6, %v320_v34 }
 0x2c1   : > { %v412_v35 = vpop.permute.xlu0 %411  ;;  %v504_v36 = vpop.permute.xlu1 %503 }
 0x2c2   : > { %415 = vst.msk [vmem:[%s134_s14] sm:$0xff] %vm414_vm7, %v412_v35 }
 0x2c3   : > { %507 = vst.msk [vmem:[%s134_s14] sm:$0xff] %vm506_vm8, %v504_v36 }
 0x2c4   : > { %719 = shalt.err (!%p716_p3)
}
 0x2c5   : > { %s720_s3 = scalar_lea.hbm %s880_s26, 128  ;;  %s724_s6 = scalar_lea.hbm %s926_s2, 256 }
 0x2c6   : > { %p721_p4 = scmp.ne.s32.totalorder %s880_s26, %s720_s3  ;;  %p725_p9 = scmp.lt.u32.totalorder %s880_s26, %s926_s2 }
 0x2c7   : > { %p726_p10 = scmp.lt.u32.totalorder %s724_s6, %s720_s3  ;;  %p728_p12 = scmp.lt.u32.totalorder %s720_s3, %s880_s26 }
 0x2c8   : > { %p722_p7 = pnand %p721_p4, %p836_p5 }
 0x2c9   : > { %p727_p11 = por %p726_p10, %p725_p9 }
 0x2ca   : > { %p723_p8 = pneg %p722_p7 }
 0x2cb   : > { %p729_p13 = por %p728_p12, %p727_p11 }
 0x2cd   : > { %p730_p0 = pnand %p729_p13, %p723_p8 }
 0x2cf   : > { %733 = shalt.err (!%p730_p0)
}
 0x2d0   : > { %655 = dma.vmem_to_hbm [thread:$0]  (%p836_p5), %s882_s23, 128, %s880_s26, %s509_s27  }
 0x2d1 PF: > { %p661_p1 = scmp.ge.s32.totalorder %s768_s12, 2  ;;  %s534_s14 = sand.u32 1, %s756_s9  }
 0x2d2   : > { %s535_s16 = scalar_lea.sflag [#allocation3], %s534_s14 }
 0x2d3   : > { %p658_p2 = pnand %p661_p1, %p840_p6 }
 0x2d5   : > { %751 = dma.done.wait (!%p658_p2), %s535_s16, 128  }
 0x2d6   : > { %753 = vsyncadd (!%p658_p2), %s535_s16, 4294967168  ;;  %p12_p3 = scmp.ge.s32.totalorder %s823_s15, 4   ;;  %s931_s9 = smov %s760_s10 }
 0x2d7   : > { %s932_s10 = smov %s764_s11  ;;  %s933_s11 = smov %s834_s18 }
 0x2d8   : > { %s934_s12 = smov %s823_s15  ;;  %14 = sbr.rel (!%p12_p3) target bundleno = 3 (0x3), region = 63 }
 0x2df   :  { %540 = vsyncpa [#allocation3], 1 }
 0x2e0   :  { %542 = vsyncpa [#allocation3 + $0x1], 1 }

</bundles_post_ra>
